<compile_context>
chip_gen: v7x
topology: tpu7x:2x2x1
jax: 0.10.0
libtpu: 0.0.40
codegen_flags: <defaults>
</compile_context>

<pallas_src>
import functools

import jax
import jax.numpy as jnp
from jax.experimental import pallas as pl
from jax.experimental.pallas import tpu as pltpu

LANE = 128  # every channel dimension is zero-padded to a full lane width


def _vmem_spec():
    # Whole (tiny) array resident in VMEM; no grid tiling needed at these sizes.
    return pl.BlockSpec(memory_space=pltpu.MemorySpace.VMEM)


def _pad2(x, rows, cols):
    r, c = x.shape
    return jnp.pad(x, ((0, rows - r), (0, cols - c)))


# --------------------------- fused Pallas kernel ----------------------------- #

def fused_gcn_kernel(a_ref, x_ref, w_ref, b_ref, pa_ref, o_ref, *,
                     num_hidden_layers):
    """Whole GCN forward in one kernel.

    a_ref  : [N, N]        bf16  normalized adjacency A_hat
    x_ref  : [N, 128]      bf16  node features (channel-padded)
    w_ref  : [L, 128, 128] bf16  slots 0..L-2: conv weights (BN folded);
                                 slot L-1: W_tail = W_{L-1} @ W_lin
    b_ref  : [L, 1, 128]   f32   matching biases; slot L-1: b_tail
    pa_ref : [Gp, N]       bf16  pool_mat @ A_hat (row-padded to Gp)
    o_ref  : [Gp, 128]     f32   output (padded; sliced outside the kernel)
    """
    a = a_ref[...]                          # hoisted; reused by every layer
    h = x_ref[...]
    for l in range(num_hidden_layers):      # layers 0 .. L-2
        # X @ W first (cheaper order), then A_hat @ (XW); bf16 in, f32 acc.
        xw = jnp.dot(h, w_ref[l], preferred_element_type=jnp.float32)
        # (v5e-only option: accumulate xw in bf16 to skip this convert; kept
        #  f32 here for accuracy.)
        hh = jnp.dot(a, xw.astype(jnp.bfloat16),
                     preferred_element_type=jnp.float32)
        hh = jnp.maximum(hh + b_ref[l], 0.0)   # bias(+folded BN) + ReLU
        h = hh.astype(jnp.bfloat16)            # dropout == identity (eval)
    # Folded tail: last conv + mean-pool + Linear == (PA @ h) @ W_tail + b_tail
    t = jnp.dot(pa_ref[...], h, preferred_element_type=jnp.float32)   # [Gp,128]
    out = jnp.dot(t.astype(jnp.bfloat16), w_ref[num_hidden_layers],
                  preferred_element_type=jnp.float32) + b_ref[num_hidden_layers]
    o_ref[...] = out                        # full unmasked (8,128) f32 store


# ------------------- one-time constant folding (hoisted) --------------------- #

def prepare_gcn(params, a_hat, pool_mat, num_layers, use_bn=True):
    """Fold BN + tail, pad channels to 128 lanes, cast once. Call ONCE."""
    ws, bs = [], []
    for l in range(num_layers - 1):
        w, b = params["convs"][l]
        if use_bn:
            scale, shift = params["bns"][l]
            w = w * scale                    # per-output-channel scale
            b = b * scale + shift
        ws.append(_pad2(w, LANE, LANE))
        bs.append(_pad2(b, 1, LANE))
    # Tail folding: compose in f32, cast once to bf16 (see correctness note).
    w_last, b_last = params["convs"][num_layers - 1]
    w_lin, b_lin = params["lin"]
    w_tail = w_last @ w_lin                  # [hidden, out]   f32 compose
    b_tail = b_last @ w_lin + b_lin          # [1, out]
    ws.append(_pad2(w_tail, LANE, LANE))
    bs.append(_pad2(b_tail, 1, LANE))

    w_stack = jnp.stack(ws).astype(jnp.bfloat16)    # [L, 128, 128]
    b_stack = jnp.stack(bs).astype(jnp.float32)     # [L, 1, 128]

    g = pool_mat.shape[0]
    g_pad = max(8, ((g + 7) // 8) * 8)               # sublane-dense output rows
    pa = pool_mat @ a_hat                            # [G, N]  f32 compose
    pa = jnp.pad(pa, ((0, g_pad - g), (0, 0))).astype(jnp.bfloat16)
    a_bf = a_hat.astype(jnp.bfloat16)
    return a_bf, w_stack, b_stack, pa


# --------------------------- per-call forward (jitted) ------------------------ #

@functools.partial(jax.jit, static_argnames=("out_channels", "num_graphs"))
def gcn_forward(x, a_bf, w_stack, b_stack, pa_bf, *, out_channels, num_graphs):
    n, c_in = x.shape
    num_slots = w_stack.shape[0]            # L (L-1 hidden layers + folded tail)
    nhl = num_slots - 1
    g_pad = pa_bf.shape[0]

    x_p = jnp.pad(x, ((0, 0), (0, LANE - c_in))).astype(jnp.bfloat16)

    flops = (2 * nhl * (n * LANE * LANE + n * n * LANE)
             + 2 * (g_pad * n * LANE + g_pad * LANE * LANE))
    bytes_accessed = (a_bf.size * 2 + x_p.size * 2 + w_stack.size * 2
                      + b_stack.size * 4 + pa_bf.size * 2 + g_pad * LANE * 4)

    kernel = functools.partial(fused_gcn_kernel, num_hidden_layers=nhl)
    out = pl.pallas_call(
        kernel,
        out_shape=jax.ShapeDtypeStruct((g_pad, LANE), jnp.float32),
        in_specs=[_vmem_spec()] * 5,
        out_specs=_vmem_spec(),
        cost_estimate=pl.CostEstimate(flops=flops, transcendentals=0,
                                      bytes_accessed=bytes_accessed),
    )(a_bf, x_p, w_stack, b_stack, pa_bf)
    return out[:num_graphs, :out_channels]


# ------------------------------- glue (plain JAX) ---------------------------- #

def build_normalized_adjacency(edge_index, num_nodes):
    """Dense A_hat = D^-1/2 (A + I) D^-1/2 for an undirected edge list."""
    src, dst = edge_index[0], edge_index[1]
    a = jnp.zeros((num_nodes, num_nodes), jnp.float32)
    a = a.at[src, dst].max(1.0)                       # dedup duplicate edges
    a = a + jnp.eye(num_nodes, dtype=jnp.float32)     # add self loops
    deg = a.sum(axis=1)
    d_inv_sqrt = jnp.where(deg > 0, 1.0 / jnp.sqrt(deg), 0.0)
    return d_inv_sqrt[:, None] * a * d_inv_sqrt[None, :]


def build_mean_pool_matrix(batch, num_graphs):
    """P[g, n] = 1/|graph g| if node n belongs to graph g else 0."""
    onehot = (batch[None, :] == jnp.arange(num_graphs)[:, None]).astype(jnp.float32)
    counts = jnp.maximum(onehot.sum(axis=1, keepdims=True), 1.0)
    return onehot / counts


def init_gcn_params(key, in_channels, hidden_channels, out_channels, num_layers):
    params = {"convs": [], "bns": []}
    dims = [in_channels] + [hidden_channels] * num_layers
    for l in range(num_layers):
        key, kw, kg, kb = jax.random.split(key, 4)
        fan_in, fan_out = dims[l], dims[l + 1]
        limit = jnp.sqrt(6.0 / (fan_in + fan_out))     # glorot, as in GCNConv
        w = jax.random.uniform(kw, (fan_in, fan_out), jnp.float32, -limit, limit)
        b = jnp.zeros((1, fan_out), jnp.float32)
        params["convs"].append((w, b))
        if l < num_layers - 1:
            gamma = 1.0 + 0.1 * jax.random.normal(kg, (1, fan_out), jnp.float32)
            beta = 0.1 * jax.random.normal(kb, (1, fan_out), jnp.float32)
            # eval-mode BN with running_mean=0, running_var=1, eps=1e-5
            scale = gamma / jnp.sqrt(1.0 + 1e-5)
            shift = beta
            params["bns"].append((scale, shift))
    key, kl = jax.random.split(key)
    limit = jnp.sqrt(1.0 / hidden_channels)
    w_lin = jax.random.uniform(kl, (hidden_channels, out_channels), jnp.float32,
                               -limit, limit)
    b_lin = jnp.zeros((1, out_channels), jnp.float32)
    params["lin"] = (w_lin, b_lin)
    return params


def gcn_reference(params, x, a_hat, pool_mat, num_layers, use_bn=True):
    """Pure-JAX f32 reference of the same eval-mode forward (unfolded)."""
    h = x
    for l in range(num_layers):
        w, b = params["convs"][l]
        h = a_hat @ (h @ w) + b
        if l < num_layers - 1:
            if use_bn:
                scale, shift = params["bns"][l]
                h = h * scale + shift
            h = jnp.maximum(h, 0.0)
    pooled = pool_mat @ h
    w_lin, b_lin = params["lin"]
    return pooled @ w_lin + b_lin


# ------------------------------------ main ----------------------------------- #

if __name__ == "__main__":
    key = jax.random.PRNGKey(0)

    # Small problem: 64 nodes, 4 graphs of 16 nodes each.
    num_nodes = 64
    num_graphs = 4
    in_channels = 16
    hidden_channels = 32
    out_channels = 8
    num_layers = 3

    key, kx, ke = jax.random.split(key, 3)
    x = jax.random.normal(kx, (num_nodes, in_channels), jnp.float32)

    # Random undirected edge_index [2, E].
    num_raw_edges = 128
    src = jax.random.randint(ke, (num_raw_edges,), 0, num_nodes)
    dst = jax.random.randint(jax.random.fold_in(ke, 1), (num_raw_edges,), 0, num_nodes)
    edge_index = jnp.stack([jnp.concatenate([src, dst]),
                            jnp.concatenate([dst, src])], axis=0)

    batch = jnp.repeat(jnp.arange(num_graphs, dtype=jnp.int32),
                       num_nodes // num_graphs)

    a_hat = build_normalized_adjacency(edge_index, num_nodes)
    pool_mat = build_mean_pool_matrix(batch, num_graphs)

    key, kp = jax.random.split(key)
    params = init_gcn_params(kp, in_channels, hidden_channels, out_channels,
                             num_layers)

    # One-time constant folding (BN fold, tail fold, padding, bf16 casts).
    a_bf, w_stack, b_stack, pa_bf = prepare_gcn(params, a_hat, pool_mat,
                                                num_layers, use_bn=True)

    out = gcn_forward(x, a_bf, w_stack, b_stack, pa_bf,
                      out_channels=out_channels, num_graphs=num_graphs)
    out = jax.block_until_ready(out)
    assert out.shape == (num_graphs, out_channels), out.shape
    assert jnp.all(jnp.isfinite(out))

    # Loose correctness check vs. f32 reference (kernel matmuls run in bf16).
    ref = gcn_reference(params, x, a_hat, pool_mat, num_layers, use_bn=True)
    err = float(jnp.max(jnp.abs(out - ref)))
    scale = float(jnp.max(jnp.abs(ref)))
    assert err <= 0.05 * scale + 0.05, (err, scale)

    print("KERNEL_OK")
</pallas_src>

<mosaic_0001>
module attributes {stable_mosaic.version = 11 : i64} {
  func.func @fused_gcn_kernel(%arg0: memref<64x64xbf16, #tpu.memory_space<vmem>>, %arg1: memref<64x128xbf16, #tpu.memory_space<vmem>>, %arg2: memref<3x128x128xbf16, #tpu.memory_space<vmem>>, %arg3: memref<3x1x128xf32, #tpu.memory_space<vmem>>, %arg4: memref<8x64xbf16, #tpu.memory_space<vmem>>, %arg5: memref<8x128xf32, #tpu.memory_space<vmem>>) attributes {dimension_semantics = [], scalar_prefetch = 0 : i64, scratch_operands = 0 : i64, tpu.core_type = #tpu.core_type<tc>} {
    %c0 = arith.constant 0 : index
    %c0_0 = arith.constant 0 : index
    %0 = vector.load %arg0[%c0, %c0_0] : memref<64x64xbf16, #tpu.memory_space<vmem>>, vector<64x64xbf16>
    %c0_1 = arith.constant 0 : index
    %c0_2 = arith.constant 0 : index
    %1 = vector.load %arg1[%c0_1, %c0_2] : memref<64x128xbf16, #tpu.memory_space<vmem>>, vector<64x128xbf16>
    %c0_3 = arith.constant 0 : index
    %c0_4 = arith.constant 0 : index
    %c0_5 = arith.constant 0 : index
    %2 = vector.load %arg2[%c0_3, %c0_4, %c0_5] : memref<3x128x128xbf16, #tpu.memory_space<vmem>>, vector<1x128x128xbf16>
    %3 = vector.shape_cast %2 : vector<1x128x128xbf16> to vector<128x128xbf16>
    %cst = arith.constant dense<0.000000e+00> : vector<64x128xf32>
    %4 = tpu.matmul %1, %3, %cst {dimension_numbers = #tpu.dot_dimension_numbers<[1], [0], [0], [1], [0, 0, 1, 1], [], []>} : vector<64x128xbf16>, vector<128x128xbf16>, vector<64x128xf32> -> vector<64x128xf32>
    %5 = arith.truncf %4 : vector<64x128xf32> to vector<64x128xbf16>
    %cst_6 = arith.constant dense<0.000000e+00> : vector<64x128xf32>
    %6 = tpu.matmul %0, %5, %cst_6 {dimension_numbers = #tpu.dot_dimension_numbers<[1], [0], [0], [1], [0, 0, 1, 1], [], []>} : vector<64x64xbf16>, vector<64x128xbf16>, vector<64x128xf32> -> vector<64x128xf32>
    %c0_7 = arith.constant 0 : index
    %c0_8 = arith.constant 0 : index
    %c0_9 = arith.constant 0 : index
    %7 = vector.load %arg3[%c0_7, %c0_8, %c0_9] : memref<3x1x128xf32, #tpu.memory_space<vmem>>, vector<1x1x128xf32>
    %8 = vector.shape_cast %7 : vector<1x1x128xf32> to vector<1x128xf32>
    %9 = vector.broadcast %8 : vector<1x128xf32> to vector<64x128xf32>
    %10 = arith.addf %6, %9 : vector<64x128xf32>
    %cst_10 = arith.constant 0.000000e+00 : f32
    %11 = vector.broadcast %cst_10 : f32 to vector<64x128xf32>
    %12 = arith.maximumf %10, %11 : vector<64x128xf32>
    %13 = arith.truncf %12 : vector<64x128xf32> to vector<64x128xbf16>
    %c1 = arith.constant 1 : index
    %c0_11 = arith.constant 0 : index
    %c0_12 = arith.constant 0 : index
    %14 = vector.load %arg2[%c1, %c0_11, %c0_12] : memref<3x128x128xbf16, #tpu.memory_space<vmem>>, vector<1x128x128xbf16>
    %15 = vector.shape_cast %14 : vector<1x128x128xbf16> to vector<128x128xbf16>
    %cst_13 = arith.constant dense<0.000000e+00> : vector<64x128xf32>
    %16 = tpu.matmul %13, %15, %cst_13 {dimension_numbers = #tpu.dot_dimension_numbers<[1], [0], [0], [1], [0, 0, 1, 1], [], []>} : vector<64x128xbf16>, vector<128x128xbf16>, vector<64x128xf32> -> vector<64x128xf32>
    %17 = arith.truncf %16 : vector<64x128xf32> to vector<64x128xbf16>
    %cst_14 = arith.constant dense<0.000000e+00> : vector<64x128xf32>
    %18 = tpu.matmul %0, %17, %cst_14 {dimension_numbers = #tpu.dot_dimension_numbers<[1], [0], [0], [1], [0, 0, 1, 1], [], []>} : vector<64x64xbf16>, vector<64x128xbf16>, vector<64x128xf32> -> vector<64x128xf32>
    %c1_15 = arith.constant 1 : index
    %c0_16 = arith.constant 0 : index
    %c0_17 = arith.constant 0 : index
    %19 = vector.load %arg3[%c1_15, %c0_16, %c0_17] : memref<3x1x128xf32, #tpu.memory_space<vmem>>, vector<1x1x128xf32>
    %20 = vector.shape_cast %19 : vector<1x1x128xf32> to vector<1x128xf32>
    %21 = vector.broadcast %20 : vector<1x128xf32> to vector<64x128xf32>
    %22 = arith.addf %18, %21 : vector<64x128xf32>
    %cst_18 = arith.constant 0.000000e+00 : f32
    %23 = vector.broadcast %cst_18 : f32 to vector<64x128xf32>
    %24 = arith.maximumf %22, %23 : vector<64x128xf32>
    %25 = arith.truncf %24 : vector<64x128xf32> to vector<64x128xbf16>
    %c0_19 = arith.constant 0 : index
    %c0_20 = arith.constant 0 : index
    %26 = vector.load %arg4[%c0_19, %c0_20] : memref<8x64xbf16, #tpu.memory_space<vmem>>, vector<8x64xbf16>
    %cst_21 = arith.constant dense<0.000000e+00> : vector<8x128xf32>
    %27 = tpu.matmul %26, %25, %cst_21 {dimension_numbers = #tpu.dot_dimension_numbers<[1], [0], [0], [1], [0, 0, 1, 1], [], []>} : vector<8x64xbf16>, vector<64x128xbf16>, vector<8x128xf32> -> vector<8x128xf32>
    %28 = arith.truncf %27 : vector<8x128xf32> to vector<8x128xbf16>
    %c2 = arith.constant 2 : index
    %c0_22 = arith.constant 0 : index
    %c0_23 = arith.constant 0 : index
    %29 = vector.load %arg2[%c2, %c0_22, %c0_23] : memref<3x128x128xbf16, #tpu.memory_space<vmem>>, vector<1x128x128xbf16>
    %30 = vector.shape_cast %29 : vector<1x128x128xbf16> to vector<128x128xbf16>
    %cst_24 = arith.constant dense<0.000000e+00> : vector<8x128xf32>
    %31 = tpu.matmul %28, %30, %cst_24 {dimension_numbers = #tpu.dot_dimension_numbers<[1], [0], [0], [1], [0, 0, 1, 1], [], []>} : vector<8x128xbf16>, vector<128x128xbf16>, vector<8x128xf32> -> vector<8x128xf32>
    %c2_25 = arith.constant 2 : index
    %c0_26 = arith.constant 0 : index
    %c0_27 = arith.constant 0 : index
    %32 = vector.load %arg3[%c2_25, %c0_26, %c0_27] : memref<3x1x128xf32, #tpu.memory_space<vmem>>, vector<1x1x128xf32>
    %33 = vector.shape_cast %32 : vector<1x1x128xf32> to vector<1x128xf32>
    %34 = vector.broadcast %33 : vector<1x128xf32> to vector<8x128xf32>
    %35 = arith.addf %31, %34 : vector<8x128xf32>
    %c0_28 = arith.constant 0 : index
    %c0_29 = arith.constant 0 : index
    %36 = vector.load %arg5[%c0_28, %c0_29] : memref<8x128xf32, #tpu.memory_space<vmem>>, vector<8x128xf32>
    tpu.vector_store %arg5[%c0_28, %c0_29], %35 {strides = array<i32>} : memref<8x128xf32, #tpu.memory_space<vmem>>, vector<8x128xf32>,
    return
  }
}

</mosaic_0001>

<bundles_post_ra>
// kernel: gcn_forward.1
= control target key start
LH: loop header
LB: loop body
LE: loop exit
PB: predicated region body
PF: predicated region fallthrough
CT: control target
= control target key end

     0   :  { %10 = vsyncpa [#allocation3], 0  ;;  %s981_s18 = smov [#allocation2]   ;;  %s1088_s0 = inlined_call_operand.vmem [shape: bf16[64,64], index: 0, kind: input, shape index: {}]   ;;  %s1089_s1 = inlined_call_operand.vmem [shape: bf16[64,128], index: 1, kind: input, shape index: {}]   ;;  %s1090_s2 = inlined_call_operand.hbm [shape: bf16[3,128,128], index: 2, kind: input, shape index: {}]   ;;  %s1091_s3 = inlined_call_operand.vmem [shape: f32[3,1,128], index: 3, kind: input, shape index: {}]   ;;  %s1092_s4 = inlined_call_operand.vmem [shape: bf16[8,64], index: 4, kind: input, shape index: {}]   ;;  %s1093_s5 = inlined_call_operand.vmem [shape: f32[8,128], index: 5, kind: output, shape index: {}]  }
   0x1   :  { %s20_s19 = sshll.u32 %s981_s18, 4  ;;  %s957_s22 = scalar_lea.hbm %s1090_s2, 3072  ;;  %s21_s19 = int_to_ptr.vmem [resolvable:$true] %s20_s19 }
   0x2   :  { %p958_p0 = scmp.ne.s32.totalorder %s1090_s2, %s957_s22  ;;  %p961_p1 = scmp.lt.u32.totalorder %s957_s22, %s1090_s2 }
   0x4   :  { %p963_p2 = pnand %p961_p1, %p958_p0 }
   0x6   :  { %966 = shalt.err (!%p963_p2)
}
   0x7   :  { %s967_s27 = scalar_lea.vmem %s21_s19, 3072  ;;  %p972_p4 = scmp.lt.s32.totalorder %s21_s19, %s21_s19 }
   0x8   :  { %p968_p3 = scmp.ne.s32.totalorder %s21_s19, %s967_s27  ;;  %p973_p5 = scmp.lt.s32.totalorder %s967_s27, %s967_s27 }
   0xa   :  { %p974_p6 = por %p973_p5, %p972_p4 }
   0xc   :  { %p975_p7 = pnand %p974_p6, %p968_p3 }
   0xe   :  { %978 = shalt.err (!%p975_p7)
}
   0xf   :  { %s982_s28 = smov 64   ;;  %s983_s29 = smov 4  }
  0x10   :  { %26 = dma.hbm_to_vmem [thread:$0]  %s1090_s2, 3072, %s21_s19, [#allocation3], %s982_s28, %s982_s28, %s983_s29  }
  0x11   :  { %979 = dma.done.wait [#allocation3], 3072  }
  0x12   :  { %980 = vsyncadd [#allocation3], 4294964224  ;;  %v925_v0 = vld [vmem:[#allocation2] sm:$0xff]   ;;  %v926_v1 = vld [vmem:[#allocation2 + $0x8] sm:$0xff]   ;;  %vm235_vm0 = vcmask 523264   ;;  %vm985_vm1 = vmmov 0  }
  0x13   :  { %808 = vmatprep.subr.bf16.mxu0 %v925_v0  ;;  %v927_v2 = vld [vmem:[#allocation2 + $0x10] sm:$0xff]   ;;  %v928_v3 = vld [vmem:[#allocation2 + $0x18] sm:$0xff]   ;;  %v933_v4 = vld [vmem:[%s1089_s1] sm:$0xff]  }
  0x14   :  { %809 = vmatpush3.bf16.msra.mxu0 %v925_v0  ;;  %824 = vmatprep.mubr.bf16.mxu0 %v933_v4  ;;  %v929_v5 = vld [vmem:[#allocation2 + $0x20] sm:$0xff]   ;;  %v930_v6 = vld [vmem:[#allocation2 + $0x28] sm:$0xff]   ;;  %v931_v7 = vld [vmem:[#allocation2 + $0x30] sm:$0xff]  }
  0x15   :  { %810 = vmatprep.subr.bf16.mxu0 %v926_v1  ;;  %v932_v8 = vld [vmem:[#allocation2 + $0x38] sm:$0xff]   ;;  %v934_v9 = vld [vmem:[%s1089_s1 + $0x8] sm:$0xff]   ;;  %v935_v10 = vld [vmem:[%s1089_s1 + $0x10] sm:$0xff]  }
  0x16   :  { %v936_v11 = vld [vmem:[%s1089_s1 + $0x18] sm:$0xff]   ;;  %v937_v12 = vld [vmem:[%s1088_s0] sm:$0xff]   ;;  %v1048_v26 = vld [vmem:[%s1088_s0 + $0x8] sm:$0xff]  }
  0x17   :  { %840 = vmatprep.mubr.msk.bf16.mxu1 %vm235_vm0, %v937_v12  ;;  %v941_v25 = vld [vmem:[#allocation2 + $0x40] sm:$0xff]   ;;  %v1053_v27 = vld [vmem:[%s1088_s0 + $0x10] sm:$0xff]   ;;  %v942_v28 = vld [vmem:[#allocation2 + $0x48] sm:$0xff]  }
  0x18   :  { %811 = vmatpush3.bf16.msra.mxu0 %v926_v1  ;;  %v943_v29 = vld [vmem:[#allocation2 + $0x50] sm:$0xff]   ;;  %v1062_v30 = vld [vmem:[%s1088_s0 + $0x18] sm:$0xff]   ;;  %v945_v32 = vld [vmem:[#allocation2 + $0x60] sm:$0xff]  }
  0x19   :  { %812 = vmatprep.subr.bf16.mxu0 %v927_v2  ;;  %v944_v31 = vld [vmem:[#allocation2 + $0x58] sm:$0xff]   ;;  %v946_v33 = vld [vmem:[#allocation2 + $0x68] sm:$0xff]   ;;  %v947_v34 = vld [vmem:[#allocation2 + $0x70] sm:$0xff]  }
  0x1a   :  { %v948_v35 = vld [vmem:[#allocation2 + $0x78] sm:$0xff]   ;;  %v720_v36 = vld [vmem:[%s1091_s3] ss:$0 sm:$0xff] }
  0x1c   :  { %813 = vmatpush3.bf16.msra.mxu0 %v927_v2 }
  0x1d   :  { %814 = vmatprep.subr.bf16.mxu0 %v928_v3 }
  0x20   :  { %815 = vmatpush3.bf16.msra.mxu0 %v928_v3 }
  0x21   :  { %816 = vmatprep.subr.bf16.mxu0 %v929_v5 }
  0x24   :  { %817 = vmatpush3.bf16.msra.mxu0 %v929_v5 }
  0x25   :  { %818 = vmatprep.subr.bf16.mxu0 %v930_v6 }
  0x28   :  { %819 = vmatpush3.bf16.msra.mxu0 %v930_v6 }
  0x29   :  { %820 = vmatprep.subr.bf16.mxu0 %v931_v7 }
  0x2c   :  { %821 = vmatpush3.bf16.msra.mxu0 %v931_v7 }
  0x2d   :  { %822 = vmatprep.subr.bf16.mxu0 %v932_v8 }
  0x30   :  { %823 = vmatpush3.bf16.msra.mxu0 %v932_v8 }
  0x33   :  { %825 = vmatmul.mubr.bf16.vlgmr.msra.gmra.mrb[0].mxu0 %v934_v9 }
  0x34   :  { %828 = vmatprep.mubr.bf16.mxu0 %v935_v10 }
  0x3b   :  { %829 = vmatmul.mubr.bf16.gmra.mrb[4].mxu0 %v936_v11 }
  0x3c   :  { %880 = vmatprep.mubr.msk.bf16.mxu0 %vm235_vm0, %v937_v12 }
 0x106   :  { %v826_v13 = vpop.f32.mrb[0].mxu0 }
 0x107   :  { %v173_v14 = vpop.f32.mrb[1].mxu0 }
 0x108   :  { %v827_v15 = vpop.f32.mrb[2].mxu0 }
 0x109   :  { %v205_v16 = vpack.c.bf16 %v827_v15, %v826_v13  ;;  %v176_v17 = vpop.f32.mrb[3].mxu0  ;;  %v984_v13 = vmov 0.0   ;;  %v950_v15 = vld [vmem:[#allocation2 + $0x88] sm:$0xff]  }
 0x10a   :  { %v204_v18 = vpack.c.bf16 %v176_v17, %v173_v14  ;;  %v949_v14 = vld [vmem:[#allocation2 + $0x80] sm:$0xff]   ;;  %v952_v17 = vld [vmem:[#allocation2 + $0x98] sm:$0xff]  }
 0x10c   :  { %832 = vmatprep.subr.bf16.mxu1 %v204_v18 }
 0x10d   :  { %833 = vmatpush3.bf16.msra.mxu1 %v204_v18  ;;  %v953_v18 = vld [vmem:[#allocation2 + $0xa0] sm:$0xff]  }
 0x10e   :  { %v830_v19 = vpop.f32.mrb[4].mxu0  ;;  %834 = vmatprep.subr.bf16.mxu1 %v205_v16 }
 0x10f   :  { %v189_v20 = vpop.f32.mrb[5].mxu0 }
 0x110   :  { %v831_v21 = vpop.f32.mrb[6].mxu0 }
 0x111   :  { %v207_v22 = vpack.c.bf16 %v831_v21, %v830_v19  ;;  %v192_v23 = vpop.f32.mrb[7].mxu0  ;;  %835 = vmatpush3.bf16.msra.mxu1 %v205_v16  ;;  %v951_v16 = vld [vmem:[#allocation2 + $0x90] sm:$0xff]   ;;  %v954_v19 = vld [vmem:[#allocation2 + $0xa8] sm:$0xff]   ;;  %v738_v21 = vld [vmem:[%s1091_s3 + $0x1] ss:$0 sm:$0xff] }
 0x112   :  { %v206_v24 = vpack.c.bf16 %v192_v23, %v189_v20  ;;  %v955_v20 = vld [vmem:[#allocation2 + $0xb0] sm:$0xff]  }
 0x114   :  { %836 = vmatprep.subr.bf16.mxu1 %v206_v24 }
 0x115   :  { %837 = vmatpush3.bf16.msra.mxu1 %v206_v24 }
 0x116   :  { %838 = vmatprep.subr.bf16.mxu1 %v207_v22 }
 0x119   :  { %839 = vmatpush3.bf16.msra.mxu1 %v207_v22 }
 0x11a   :  { %848 = vmatprep.subr.bf16.mxu1 %v941_v25 }
 0x11c   :  { %841 = vmatmul.mubr.msk.bf16.vlgmr.msra.gmra.mrb[0].mxu1 %vm235_vm0, %v1048_v26 }
 0x11d   :  { %844 = vmatprep.mubr.msk.bf16.mxu1 %vm235_vm0, %v1053_v27  ;;  %849 = vmatpush3.bf16.msra.mxu1 %v941_v25 }
 0x11e   :  { %850 = vmatprep.subr.bf16.mxu1 %v942_v28 }
 0x121   :  { %851 = vmatpush3.bf16.msra.mxu1 %v942_v28 }
 0x122   :  { %852 = vmatprep.subr.bf16.mxu1 %v943_v29 }
 0x124   :  { %845 = vmatmul.mubr.msk.bf16.gmra.mrb[4].mxu1 %vm235_vm0, %v1062_v30 }
 0x125   :  { %853 = vmatpush3.bf16.msra.mxu1 %v943_v29 }
 0x126   :  { %854 = vmatprep.subr.bf16.mxu1 %v944_v31 }
 0x129   :  { %855 = vmatpush3.bf16.msra.mxu1 %v944_v31 }
 0x12a   :  { %856 = vmatprep.subr.bf16.mxu1 %v945_v32 }
 0x12d   :  { %857 = vmatpush3.bf16.msra.mxu1 %v945_v32 }
 0x12e   :  { %858 = vmatprep.subr.bf16.mxu1 %v946_v33 }
 0x131   :  { %859 = vmatpush3.bf16.msra.mxu1 %v946_v33 }
 0x132   :  { %860 = vmatprep.subr.bf16.mxu1 %v947_v34 }
 0x135   :  { %861 = vmatpush3.bf16.msra.mxu1 %v947_v34 }
 0x136   :  { %862 = vmatprep.subr.bf16.mxu1 %v948_v35 }
 0x139   :  { %863 = vmatpush3.bf16.msra.mxu1 %v948_v35 }
 0x13a   :  { %900 = vmatprep.subr.bf16.mxu1 %v984_v13 }
 0x1ef   :  { %v842_v37 = vpop.f32.mrb[0].mxu1 }
 0x1f0   :  { %v291_v38 = vadd.f32 %v842_v37, %v720_v36  ;;  %v282_v39 = vpop.f32.mrb[1].mxu1 }
 0x1f1   :  { %v283_v40 = vadd.f32 %v720_v36, %v282_v39  ;;  %v843_v41 = vpop.f32.mrb[2].mxu1 }
 0x1f2   :  { %v294_v42 = vadd.f32 %v843_v41, %v720_v36  ;;  %v285_v43 = vpop.f32.mrb[3].mxu1  ;;  %v315_v45 = vmax.f32 %v291_v38, 0.0 }
 0x1f3   :  { %v286_v44 = vadd.f32 %v720_v36, %v285_v43  ;;  %v313_v47 = vmax.f32 %v283_v40, 0.0 }
 0x1f4   :  { %v316_v46 = vmax.f32 %v294_v42, 0.0 }
 0x1f5   :  { %v314_v48 = vmax.f32 %v286_v44, 0.0 }
 0x1f6   :  { %v322_v49 = vpack.c.bf16 %v316_v46, %v315_v45 }
 0x1f7   :  { %v321_v50 = vpack.c.bf16 %v314_v48, %v313_v47  ;;  %v846_v51 = vpop.f32.mrb[4].mxu1 }
 0x1f8   :  { %v307_v52 = vadd.f32 %v846_v51, %v720_v36  ;;  %v298_v53 = vpop.f32.mrb[5].mxu1  ;;  %v956_v51 = vld [vmem:[#allocation2 + $0xb8] sm:$0xff]  }
 0x1f9   :  { %v299_v54 = vadd.f32 %v720_v36, %v298_v53  ;;  %v847_v55 = vpop.f32.mrb[6].mxu1  ;;  %864 = vmatprep.mubr.bf16.mxu1 %v321_v50  ;;  %v544_v50 = vld [vmem:[%s1092_s4] sm:$0xf] }
 0x1fa   :  { %v310_v56 = vadd.f32 %v847_v55, %v720_v36  ;;  %v301_v57 = vpop.f32.mrb[7].mxu1  ;;  %865 = vmatmul.mubr.bf16.vlgmr.msra.gmra.mrb[8].mxu1 %v322_v49  ;;  %v319_v59 = vmax.f32 %v307_v52, 0.0 }
 0x1fb   :  { %v302_v58 = vadd.f32 %v720_v36, %v301_v57  ;;  %v317_v61 = vmax.f32 %v299_v54, 0.0  ;;  %901 = vmatpush3.bf16.msra.mxu1 %v949_v14  ;;  %v745_v57 = vld [vmem:[%s1091_s3 + $0x2] ss:$0 sm:$0xff] }
 0x1fc   :  { %v320_v60 = vmax.f32 %v310_v56, 0.0  ;;  %902 = vmatprep.subr.bf16.mxu1 %v984_v13 }
 0x1fd   :  { %v318_v62 = vmax.f32 %v302_v58, 0.0 }
 0x1fe   :  { %v324_v63 = vpack.c.bf16 %v320_v60, %v319_v59 }
 0x1ff   :  { %v323_v0 = vpack.c.bf16 %v318_v62, %v317_v61  ;;  %903 = vmatpush3.bf16.msra.mxu1 %v950_v15 }
 0x200   :  { %904 = vmatprep.subr.bf16.mxu1 %v984_v13 }
 0x201   :  { %868 = vmatprep.mubr.bf16.mxu1 %v323_v0 }
 0x202   :  { %869 = vmatmul.mubr.bf16.gmra.mrb[12].mxu1 %v324_v63 }
 0x203   :  { %916 = vmatprep.mubr.msk.bf16.mxu1 %vm985_vm1, %v984_v13  ;;  %905 = vmatpush3.bf16.msra.mxu1 %v951_v16 }
 0x204   :  { %906 = vmatprep.subr.bf16.mxu1 %v984_v13 }
 0x207   :  { %907 = vmatpush3.bf16.msra.mxu1 %v952_v17 }
 0x208   :  { %908 = vmatprep.subr.bf16.mxu1 %v984_v13 }
 0x20b   :  { %909 = vmatpush3.bf16.msra.mxu1 %v953_v18 }
 0x20c   :  { %910 = vmatprep.subr.bf16.mxu1 %v984_v13 }
 0x20f   :  { %911 = vmatpush3.bf16.msra.mxu1 %v954_v19 }
 0x210   :  { %912 = vmatprep.subr.bf16.mxu1 %v984_v13 }
 0x213   :  { %913 = vmatpush3.bf16.msra.mxu1 %v955_v20 }
 0x214   :  { %914 = vmatprep.subr.bf16.mxu1 %v984_v13 }
 0x217   :  { %915 = vmatpush3.bf16.msra.mxu1 %v956_v51 }
 0x2cd   :  { %v866_v1 = vpop.f32.mrb[8].mxu1 }
 0x2ce   :  { %v424_v2 = vpop.f32.mrb[9].mxu1 }
 0x2cf   :  { %v867_v3 = vpop.f32.mrb[10].mxu1 }
 0x2d0   :  { %v456_v4 = vpack.c.bf16 %v867_v3, %v866_v1  ;;  %v427_v5 = vpop.f32.mrb[11].mxu1 }
 0x2d1   :  { %v455_v6 = vpack.c.bf16 %v427_v5, %v424_v2 }
 0x2d3   :  { %872 = vmatprep.subr.bf16.mxu0 %v455_v6 }
 0x2d4   :  { %873 = vmatpush3.bf16.msra.mxu0 %v455_v6 }
 0x2d5   :  { %v870_v7 = vpop.f32.mrb[12].mxu1  ;;  %874 = vmatprep.subr.bf16.mxu0 %v456_v4 }
 0x2d6   :  { %v440_v8 = vpop.f32.mrb[13].mxu1 }
 0x2d7   :  { %v871_v9 = vpop.f32.mrb[14].mxu1 }
 0x2d8   :  { %v458_v10 = vpack.c.bf16 %v871_v9, %v870_v7  ;;  %v443_v11 = vpop.f32.mrb[15].mxu1  ;;  %875 = vmatpush3.bf16.msra.mxu0 %v456_v4 }
 0x2d9   :  { %v457_v12 = vpack.c.bf16 %v443_v11, %v440_v8 }
 0x2db   :  { %876 = vmatprep.subr.bf16.mxu0 %v457_v12 }
 0x2dc   :  { %877 = vmatpush3.bf16.msra.mxu0 %v457_v12 }
 0x2dd   :  { %878 = vmatprep.subr.bf16.mxu0 %v458_v10 }
 0x2e0   :  { %879 = vmatpush3.bf16.msra.mxu0 %v458_v10 }
 0x2e1   :  { %888 = vmatprep.subr.bf16.mxu0 %v984_v13 }
 0x2e3   :  { %881 = vmatmul.mubr.msk.bf16.vlgmr.msra.gmra.mrb[8].mxu0 %vm235_vm0, %v1048_v26 }
 0x2e4   :  { %884 = vmatprep.mubr.msk.bf16.mxu0 %vm235_vm0, %v1053_v27 }
 0x2eb   :  { %885 = vmatmul.mubr.msk.bf16.gmra.mrb[12].mxu0 %vm235_vm0, %v1062_v30 }
 0x2ec   :  { %896 = vmatprep.mubr.msk.bf16.mxu0 %vm985_vm1, %v984_v13 }
 0x3b6   :  { %v882_v22 = vpop.f32.mrb[8].mxu0 }
 0x3b7   :  { %v510_v23 = vadd.f32 %v882_v22, %v738_v21  ;;  %v501_v24 = vpop.f32.mrb[9].mxu0 }
 0x3b8   :  { %v502_v25 = vadd.f32 %v738_v21, %v501_v24  ;;  %v883_v26 = vpop.f32.mrb[10].mxu0 }
 0x3b9   :  { %v513_v27 = vadd.f32 %v883_v26, %v738_v21  ;;  %v504_v28 = vpop.f32.mrb[11].mxu0  ;;  %v534_v30 = vmax.f32 %v510_v23, 0.0 }
 0x3ba   :  { %v505_v29 = vadd.f32 %v738_v21, %v504_v28  ;;  %v532_v32 = vmax.f32 %v502_v25, 0.0 }
 0x3bb   :  { %v535_v31 = vmax.f32 %v513_v27, 0.0 }
 0x3bc   :  { %v533_v33 = vmax.f32 %v505_v29, 0.0 }
 0x3bd   :  { %v541_v34 = vpack.c.bf16 %v535_v31, %v534_v30 }
 0x3be   :  { %v540_v35 = vpack.c.bf16 %v533_v33, %v532_v32  ;;  %v886_v36 = vpop.f32.mrb[12].mxu0 }
 0x3bf   :  { %v526_v37 = vadd.f32 %v886_v36, %v738_v21  ;;  %v517_v38 = vpop.f32.mrb[13].mxu0 }
 0x3c0   :  { %v518_v39 = vadd.f32 %v738_v21, %v517_v38  ;;  %v887_v40 = vpop.f32.mrb[14].mxu0  ;;  %889 = vmatpush3.bf16.msra.mxu0 %v540_v35 }
 0x3c1   :  { %v529_v41 = vadd.f32 %v887_v40, %v738_v21  ;;  %v520_v42 = vpop.f32.mrb[15].mxu0  ;;  %890 = vmatprep.subr.bf16.mxu0 %v984_v13  ;;  %v538_v44 = vmax.f32 %v526_v37, 0.0 }
 0x3c2   :  { %v521_v43 = vadd.f32 %v738_v21, %v520_v42  ;;  %v536_v46 = vmax.f32 %v518_v39, 0.0 }
 0x3c3   :  { %v539_v45 = vmax.f32 %v529_v41, 0.0 }
 0x3c4   :  { %v537_v47 = vmax.f32 %v521_v43, 0.0  ;;  %891 = vmatpush3.bf16.msra.mxu0 %v541_v34 }
 0x3c5   :  { %v543_v48 = vpack.c.bf16 %v539_v45, %v538_v44  ;;  %892 = vmatprep.subr.bf16.mxu0 %v984_v13 }
 0x3c6   :  { %v542_v49 = vpack.c.bf16 %v537_v47, %v536_v46 }
 0x3c8   :  { %893 = vmatpush3.bf16.msra.mxu0 %v542_v49 }
 0x3c9   :  { %894 = vmatprep.subr.bf16.mxu0 %v984_v13 }
 0x3cc   :  { %895 = vmatpush3.bf16.msra.mxu0 %v543_v48 }
 0x3cf   :  { %897 = vmatmul.mubr.msk.bf16.vlgmr.msra.gmra.mrb[16].mxu0 %vm235_vm0, %v544_v50 }
 0x4a2   :  { %v582_v52 = vpop.f32.mrb[16].mxu0 }
 0x4a3   :  { %v588_v53 = vpack.c.bf16 %v582_v52, %v582_v52  ;;  %v898_v54 = vpop.f32.mrb[17].mxu0 }
 0x4a4   :  { %v585_v55 = vpop.f32.mrb[18].mxu0 }
 0x4a5   :  { %v899_v56 = vpop.f32.mrb[19].mxu0  ;;  %917 = vmatmul.mubr.bf16.vlgmr.msra.gmra.mrb[16].mxu1 %v588_v53 }
 0x578   :  { %v696_v58 = vpop.f32.mrb[16].mxu1 }
 0x579   :  { %v697_v59 = vadd.f32 %v745_v57, %v696_v58  ;;  %v918_v60 = vpop.f32.mrb[17].mxu1 }
 0x57a   :  { %v699_v61 = vpop.f32.mrb[18].mxu1 }
 0x57b   :  { %702 = vst [vmem:[%s1093_s5] sm:$0xff] %v697_v59  ;;  %v919_v62 = vpop.f32.mrb[19].mxu1 }
 0x57c   :  { %707 = vsyncpa [#allocation3], 1 }

</bundles_post_ra>
